<compile_context>
chip_gen: v5e
topology: v5e:2x2
jax: 0.10.0
libtpu: 0.0.40
codegen_flags: <defaults>
</compile_context>

<pallas_src>
import functools
from typing import NamedTuple, Tuple

import jax
import jax.numpy as jnp
from jax.experimental import pallas as pl
from jax.experimental.pallas import tpu as pltpu


_LANE = 128
_ROW_ALIGN = 16            # multiple of both f32 (8) and bf16 (16) sublane tiles
_V5E_SCOPED_VMEM = 16 * 1024 * 1024


def _round_up(x: int, m: int) -> int:
    return ((x + m - 1) // m) * m


# --------------------------------------------------------------------------
# Kernel
# --------------------------------------------------------------------------
def _mlp_kernel(*refs, num_layers: int, compute_dtype):
    """refs = (x_ref, w0_ref, b0_ref, w1_ref, b1_ref, ..., o_ref).

    x_ref : (tm, in_dim)  native x dtype (cast to compute_dtype in-kernel)
    w_i   : (Kp_i, Np_i)  compute_dtype (lane-padded, resident in VMEM)
    b_i   : (1, Np_i)     float32
    o_ref : (tm, Np_last) store dtype (bf16 when compute dtype is bf16)
    Hidden activations live only in VMEM/registers.
    """
    x_ref = refs[0]
    o_ref = refs[-1]

    h = x_ref[...].astype(compute_dtype)
    for i in range(num_layers):
        w_ref = refs[1 + 2 * i]
        b_ref = refs[2 + 2 * i]
        acc = jnp.dot(h, w_ref[...], preferred_element_type=jnp.float32)
        acc = acc + b_ref[...].astype(jnp.float32)
        if i < num_layers - 1:
            h = jnp.maximum(acc, 0.0).astype(compute_dtype)   # ReLU between layers
        else:
            o_ref[...] = acc.astype(o_ref.dtype)


# --------------------------------------------------------------------------
# One-time parameter preparation (hoisted out of the forward pass)
# --------------------------------------------------------------------------
class PreparedMLP(NamedTuple):
    layers: Tuple          # ((wp, bp), ...)  padded, compute-dtype weights
    in_dim: int
    out_dim: int


def prepare_params(params, *, compute_dtype=jnp.bfloat16) -> PreparedMLP:
    """Cast + lane-pad weights/biases ONCE; reuse the result for every forward.

    params: list of (w, b) with w shaped (in, out)  (transposed vs nn.Linear).
    Layer 0 keeps its native K (= in_dim) so x needs no feature padding;
    all output widths (and subsequent Ks) are padded to multiples of 128.
    Zero padding is exact for matmul + bias + ReLU.
    """
    in_dim = params[0][0].shape[0]
    out_dim = params[-1][0].shape[1]
    n_dims = [w.shape[1] for (w, _) in params]
    np_dims = [_round_up(n, _LANE) for n in n_dims]
    kp_dims = [in_dim] + np_dims[:-1]

    layers = []
    for (w, b), kp, np_ in zip(params, kp_dims, np_dims):
        wp = jnp.pad(w.astype(compute_dtype),
                     ((0, kp - w.shape[0]), (0, np_ - w.shape[1])))
        bp = jnp.pad(b.astype(jnp.float32).reshape(1, -1),
                     ((0, 0), (0, np_ - b.shape[0])))
        layers.append((wp, bp))
    return PreparedMLP(layers=tuple(layers), in_dim=in_dim, out_dim=out_dim)


# --------------------------------------------------------------------------
# Forward wrapper
# --------------------------------------------------------------------------
def mlp_forward(x, prep: PreparedMLP, *, tm: int = 512):
    """Fused MLP forward. x: (..., in_dim) -> (..., out_dim)."""
    lead = x.shape[:-1]
    in_dim = x.shape[-1]
    assert in_dim == prep.in_dim, "input feature dim mismatch"
    num_layers = len(prep.layers)
    compute_dtype = prep.layers[0][0].dtype

    xf = x.reshape(-1, in_dim)          # no pad, no cast: streamed as-is
    M = xf.shape[0]

    # Row tile: big (mem-/overhead-bound), but capped at ~ceil(M/2) so the
    # grid has >= 2 steps whenever possible -> both v7x TCs get work.
    half = _round_up(-(-M // 2), _ROW_ALIGN)
    tm_eff = max(_ROW_ALIGN, min(_round_up(tm, _ROW_ALIGN), half))
    grid = pl.cdiv(M, tm_eff)           # ragged last block; OOB rows are masked

    out_p = prep.layers[-1][0].shape[1]
    # Narrow (bf16) writeback when the compute dtype is narrower than x.dtype.
    store_dtype = (compute_dtype
                   if jnp.dtype(compute_dtype).itemsize < jnp.dtype(x.dtype).itemsize
                   else x.dtype)

    args = [xf]
    in_specs = [pl.BlockSpec((tm_eff, in_dim), lambda i: (i, 0))]
    flops = 0
    for (wp, bp) in prep.layers:
        kp, np_ = wp.shape
        args += [wp, bp]
        # Constant index_map -> weights/bias stay resident across grid steps.
        in_specs += [pl.BlockSpec((kp, np_), lambda i: (0, 0)),
                     pl.BlockSpec((1, np_), lambda i: (0, 0))]
        flops += 2 * M * kp * np_

    bytes_accessed = int(
        xf.size * xf.dtype.itemsize
        + sum(a.size * a.dtype.itemsize for a in args[1:])
        + M * out_p * jnp.dtype(store_dtype).itemsize)

    # Scoped-VMEM estimate (x/out blocks double-buffered + resident params +
    # f32 hidden tiles).  Only request a larger limit if it would exceed
    # v5e's 16 MiB default scoped limit.
    csize = jnp.dtype(compute_dtype).itemsize
    max_np = max(w.shape[1] for (w, _) in prep.layers)
    vmem_est = (2 * tm_eff * in_dim * xf.dtype.itemsize
                + 2 * tm_eff * out_p * jnp.dtype(store_dtype).itemsize
                + 2 * sum(w.size * csize + b.size * 4 for (w, b) in prep.layers)
                + 2 * tm_eff * max_np * 4)
    vmem_limit = None
    if vmem_est > int(0.85 * _V5E_SCOPED_VMEM):
        vmem_limit = int(min(vmem_est * 2, 96 * 1024 * 1024))

    kernel = functools.partial(_mlp_kernel,
                               num_layers=num_layers,
                               compute_dtype=compute_dtype)

    out = pl.pallas_call(
        kernel,
        out_shape=jax.ShapeDtypeStruct((M, out_p), store_dtype),
        grid_spec=pltpu.PrefetchScalarGridSpec(
            num_scalar_prefetch=0,
            grid=(grid,),
            in_specs=in_specs,
            out_specs=pl.BlockSpec((tm_eff, out_p), lambda i: (i, 0)),
        ),
        compiler_params=pltpu.CompilerParams(
            # Row tiles are independent -> shard across both TCs on v7x.
            dimension_semantics=("parallel",),
            vmem_limit_bytes=vmem_limit,
        ),
        cost_estimate=pl.CostEstimate(
            flops=flops, transcendentals=0, bytes_accessed=bytes_accessed),
    )(*args)

    # Strip lane padding of the last layer, restore x dtype and leading shape.
    return out[:, :prep.out_dim].astype(x.dtype).reshape(*lead, prep.out_dim)


# --------------------------------------------------------------------------
# Init + reference
# --------------------------------------------------------------------------
def init_mlp_params(key, in_dim, hid_dim, out_dim, num_layers, dtype=jnp.float32):
    """Layer shapes matching the PyTorch module (weights stored (in, out))."""
    h = [hid_dim] * (num_layers - 1)
    dims_in = [in_dim] + h
    dims_out = h + [out_dim]
    params = []
    for n, k in zip(dims_in, dims_out):
        key, kw, kb = jax.random.split(key, 3)
        bound = 1.0 / (n ** 0.5)
        w = jax.random.uniform(kw, (n, k), dtype, -bound, bound)
        b = jax.random.uniform(kb, (k,), dtype, -bound, bound)
        params.append((w, b))
    return params


def mlp_reference(x, params, *, compute_dtype=jnp.float32):
    """Plain-JAX reference mirroring the kernel's precision policy."""
    num_layers = len(params)
    store_dtype = (compute_dtype
                   if jnp.dtype(compute_dtype).itemsize < jnp.dtype(x.dtype).itemsize
                   else x.dtype)
    h = x.astype(compute_dtype)
    out = None
    for i, (w, b) in enumerate(params):
        acc = jnp.dot(h, w.astype(compute_dtype),
                      preferred_element_type=jnp.float32)
        acc = acc + b.astype(jnp.float32)
        if i < num_layers - 1:
            h = jnp.maximum(acc, 0.0).astype(compute_dtype)
        else:
            out = acc.astype(store_dtype).astype(x.dtype)
    return out


if __name__ == "__main__":
    key = jax.random.PRNGKey(0)
    kx, kp = jax.random.split(key)

    batch, seq = 2, 8
    in_dim, hid_dim, out_dim, num_layers = 32, 64, 4, 3

    x = jax.random.normal(kx, (batch, seq, in_dim), jnp.float32)
    params = init_mlp_params(kp, in_dim, hid_dim, out_dim, num_layers)

    # 1) Default path: params prepared once (bf16, lane-padded), bf16 MXU +
    #    f32 accumulation, bf16 writeback. Compared vs matched-policy ref.
    prep_bf16 = prepare_params(params, compute_dtype=jnp.bfloat16)
    out = jax.block_until_ready(mlp_forward(x, prep_bf16))
    ref_bf16 = mlp_reference(x, params, compute_dtype=jnp.bfloat16)
    assert out.shape == (batch, seq, out_dim)
    assert jnp.allclose(out, ref_bf16, atol=1e-2, rtol=1e-2), "bf16 mismatch"

    # 2) Non-tile-aligned row count (exercises the ragged cdiv last block).
    x2 = jax.random.normal(kx, (3, 10, in_dim), jnp.float32)
    out2 = jax.block_until_ready(mlp_forward(x2, prep_bf16))
    ref2 = mlp_reference(x2, params, compute_dtype=jnp.bfloat16)
    assert out2.shape == (3, 10, out_dim)
    assert jnp.allclose(out2, ref2, atol=1e-2, rtol=1e-2), "ragged-M mismatch"

    # 3) Full-f32 compute path: tight check against the exact reference.
    prep_f32 = prepare_params(params, compute_dtype=jnp.float32)
    out_f32 = jax.block_until_ready(mlp_forward(x, prep_f32))
    ref_f32 = mlp_reference(x, params, compute_dtype=jnp.float32)
    assert jnp.allclose(out_f32, ref_f32, atol=1e-5, rtol=1e-5), "f32 mismatch"

    print("KERNEL_OK")
</pallas_src>

<mosaic_0001>
module attributes {stable_mosaic.version = 11 : i64} {
  func.func @_mlp_kernel(%arg0: i32, %arg1: memref<16x32xf32, #tpu.memory_space<vmem>>, %arg2: memref<32x128xbf16, #tpu.memory_space<vmem>>, %arg3: memref<1x128xf32, #tpu.memory_space<vmem>>, %arg4: memref<128x128xbf16, #tpu.memory_space<vmem>>, %arg5: memref<1x128xf32, #tpu.memory_space<vmem>>, %arg6: memref<128x128xbf16, #tpu.memory_space<vmem>>, %arg7: memref<1x128xf32, #tpu.memory_space<vmem>>, %arg8: memref<16x128xbf16, #tpu.memory_space<vmem>>) attributes {dimension_semantics = [#tpu.dimension_semantics<parallel>], iteration_bounds = array<i64: 1>, scalar_prefetch = 0 : i64, scratch_operands = 0 : i64, tpu.core_type = #tpu.core_type<tc>, window_params = [{transform_indices = @transform_0, window_bounds = array<i64: 16, 32>}, {pipeline_mode = #tpu.pipeline_mode<synchronous>, transform_indices = @transform_1, window_bounds = array<i64: 32, 128>}, {pipeline_mode = #tpu.pipeline_mode<synchronous>, transform_indices = @transform_2, window_bounds = array<i64: 1, 128>}, {pipeline_mode = #tpu.pipeline_mode<synchronous>, transform_indices = @transform_3, window_bounds = array<i64: 128, 128>}, {pipeline_mode = #tpu.pipeline_mode<synchronous>, transform_indices = @transform_4, window_bounds = array<i64: 1, 128>}, {pipeline_mode = #tpu.pipeline_mode<synchronous>, transform_indices = @transform_5, window_bounds = array<i64: 128, 128>}, {pipeline_mode = #tpu.pipeline_mode<synchronous>, transform_indices = @transform_6, window_bounds = array<i64: 1, 128>}, {transform_indices = @transform_7, window_bounds = array<i64: 16, 128>}]} {
    %c0 = arith.constant 0 : index
    %c0_0 = arith.constant 0 : index
    %0 = vector.load %arg1[%c0, %c0_0] : memref<16x32xf32, #tpu.memory_space<vmem>>, vector<16x32xf32>
    %1 = arith.truncf %0 : vector<16x32xf32> to vector<16x32xbf16>
    %c0_1 = arith.constant 0 : index
    %c0_2 = arith.constant 0 : index
    %2 = vector.load %arg2[%c0_1, %c0_2] : memref<32x128xbf16, #tpu.memory_space<vmem>>, vector<32x128xbf16>
    %cst = arith.constant dense<0.000000e+00> : vector<16x128xf32>
    %3 = tpu.matmul %1, %2, %cst {dimension_numbers = #tpu.dot_dimension_numbers<[1], [0], [0], [1], [0, 0, 1, 1], [], []>} : vector<16x32xbf16>, vector<32x128xbf16>, vector<16x128xf32> -> vector<16x128xf32>
    %c0_3 = arith.constant 0 : index
    %c0_4 = arith.constant 0 : index
    %4 = vector.load %arg3[%c0_3, %c0_4] : memref<1x128xf32, #tpu.memory_space<vmem>>, vector<1x128xf32>
    %5 = vector.broadcast %4 : vector<1x128xf32> to vector<16x128xf32>
    %6 = arith.addf %3, %5 : vector<16x128xf32>
    %cst_5 = arith.constant 0.000000e+00 : f32
    %7 = vector.broadcast %cst_5 : f32 to vector<16x128xf32>
    %8 = arith.maximumf %6, %7 : vector<16x128xf32>
    %9 = arith.truncf %8 : vector<16x128xf32> to vector<16x128xbf16>
    %c0_6 = arith.constant 0 : index
    %c0_7 = arith.constant 0 : index
    %10 = vector.load %arg4[%c0_6, %c0_7] : memref<128x128xbf16, #tpu.memory_space<vmem>>, vector<128x128xbf16>
    %cst_8 = arith.constant dense<0.000000e+00> : vector<16x128xf32>
    %11 = tpu.matmul %9, %10, %cst_8 {dimension_numbers = #tpu.dot_dimension_numbers<[1], [0], [0], [1], [0, 0, 1, 1], [], []>} : vector<16x128xbf16>, vector<128x128xbf16>, vector<16x128xf32> -> vector<16x128xf32>
    %c0_9 = arith.constant 0 : index
    %c0_10 = arith.constant 0 : index
    %12 = vector.load %arg5[%c0_9, %c0_10] : memref<1x128xf32, #tpu.memory_space<vmem>>, vector<1x128xf32>
    %13 = vector.broadcast %12 : vector<1x128xf32> to vector<16x128xf32>
    %14 = arith.addf %11, %13 : vector<16x128xf32>
    %cst_11 = arith.constant 0.000000e+00 : f32
    %15 = vector.broadcast %cst_11 : f32 to vector<16x128xf32>
    %16 = arith.maximumf %14, %15 : vector<16x128xf32>
    %17 = arith.truncf %16 : vector<16x128xf32> to vector<16x128xbf16>
    %c0_12 = arith.constant 0 : index
    %c0_13 = arith.constant 0 : index
    %18 = vector.load %arg6[%c0_12, %c0_13] : memref<128x128xbf16, #tpu.memory_space<vmem>>, vector<128x128xbf16>
    %cst_14 = arith.constant dense<0.000000e+00> : vector<16x128xf32>
    %19 = tpu.matmul %17, %18, %cst_14 {dimension_numbers = #tpu.dot_dimension_numbers<[1], [0], [0], [1], [0, 0, 1, 1], [], []>} : vector<16x128xbf16>, vector<128x128xbf16>, vector<16x128xf32> -> vector<16x128xf32>
    %c0_15 = arith.constant 0 : index
    %c0_16 = arith.constant 0 : index
    %20 = vector.load %arg7[%c0_15, %c0_16] : memref<1x128xf32, #tpu.memory_space<vmem>>, vector<1x128xf32>
    %21 = vector.broadcast %20 : vector<1x128xf32> to vector<16x128xf32>
    %22 = arith.addf %19, %21 : vector<16x128xf32>
    %23 = arith.truncf %22 : vector<16x128xf32> to vector<16x128xbf16>
    %c0_17 = arith.constant 0 : index
    %c0_18 = arith.constant 0 : index
    %24 = vector.load %arg8[%c0_17, %c0_18] : memref<16x128xbf16, #tpu.memory_space<vmem>>, vector<16x128xbf16>
    tpu.vector_store %arg8[%c0_17, %c0_18], %23 {strides = array<i32>} : memref<16x128xbf16, #tpu.memory_space<vmem>>, vector<16x128xbf16>,
    return
  }
  func.func @transform_0(%arg0: i32) -> (i32, i32) {
    %c0_i32 = arith.constant 0 : i32
    %c0_i32_0 = arith.constant 0 : i32
    return %arg0, %c0_i32 : i32, i32
  }
  func.func @transform_1(%arg0: i32) -> (i32, i32) {
    %c0_i32 = arith.constant 0 : i32
    %c0_i32_0 = arith.constant 0 : i32
    %c0_i32_1 = arith.constant 0 : i32
    return %c0_i32, %c0_i32_0 : i32, i32
  }
  func.func @transform_2(%arg0: i32) -> (i32, i32) {
    %c0_i32 = arith.constant 0 : i32
    %c0_i32_0 = arith.constant 0 : i32
    %c0_i32_1 = arith.constant 0 : i32
    return %c0_i32, %c0_i32_0 : i32, i32
  }
  func.func @transform_3(%arg0: i32) -> (i32, i32) {
    %c0_i32 = arith.constant 0 : i32
    %c0_i32_0 = arith.constant 0 : i32
    %c0_i32_1 = arith.constant 0 : i32
    return %c0_i32, %c0_i32_0 : i32, i32
  }
  func.func @transform_4(%arg0: i32) -> (i32, i32) {
    %c0_i32 = arith.constant 0 : i32
    %c0_i32_0 = arith.constant 0 : i32
    %c0_i32_1 = arith.constant 0 : i32
    return %c0_i32, %c0_i32_0 : i32, i32
  }
  func.func @transform_5(%arg0: i32) -> (i32, i32) {
    %c0_i32 = arith.constant 0 : i32
    %c0_i32_0 = arith.constant 0 : i32
    %c0_i32_1 = arith.constant 0 : i32
    return %c0_i32, %c0_i32_0 : i32, i32
  }
  func.func @transform_6(%arg0: i32) -> (i32, i32) {
    %c0_i32 = arith.constant 0 : i32
    %c0_i32_0 = arith.constant 0 : i32
    %c0_i32_1 = arith.constant 0 : i32
    return %c0_i32, %c0_i32_0 : i32, i32
  }
  func.func @transform_7(%arg0: i32) -> (i32, i32) {
    %c0_i32 = arith.constant 0 : i32
    %c0_i32_0 = arith.constant 0 : i32
    return %arg0, %c0_i32 : i32, i32
  }
}

</mosaic_0001>

<bundles_post_ra>
// kernel: tpu_custom_call.1
= control target key start
LH: loop header
LB: loop body
LE: loop exit
PB: predicated region body
PF: predicated region fallthrough
CT: control target
= control target key end

     0   :  { %12 = vsyncpa [#allocation3], 0  ;;  %s648_s0 = inlined_call_operand.hbm [shape: f32[16,32], index: 0, kind: input, shape index: {}]   ;;  %s649_s1 = inlined_call_operand.hbm [shape: bf16[32,128], index: 1, kind: input, shape index: {}]   ;;  %s650_s2 = inlined_call_operand.vmem [shape: f32[1,128], index: 2, kind: input, shape index: {}]   ;;  %s651_s3 = inlined_call_operand.hbm [shape: bf16[128,128], index: 3, kind: input, shape index: {}]   ;;  %s652_s4 = inlined_call_operand.vmem [shape: f32[1,128], index: 4, kind: input, shape index: {}]   ;;  %s653_s5 = inlined_call_operand.hbm [shape: bf16[128,128], index: 5, kind: input, shape index: {}]   ;;  %s654_s6 = inlined_call_operand.vmem [shape: f32[1,128], index: 6, kind: input, shape index: {}]   ;;  %s655_s7 = inlined_call_operand.hbm [shape: bf16[16,128], index: 7, kind: output, shape index: {}]  }
   0x1   :  { %13 = vsyncpa [#allocation6], 0 }
   0x2   :  { %14 = vsyncpa [#allocation9], 0  ;;  %s33_s26 = sshll.u32 %s649_s1, 4  ;;  %s34_s26 = int_to_ptr.hbm [resolvable:$true] %s33_s26 }
   0x3   :  { %15 = vsyncpa [#allocation4], 0  ;;  %s563_s27 = smov [#allocation5]   ;;  %s20_s8 = sshll.u32 %s648_s0, 4  ;;  %s21_s8 = int_to_ptr.hbm [resolvable:$true] %s20_s8 }
   0x4   :  { %s35_s28 = sshll.u32 %s563_s27, 4  ;;  %s564_s9 = smov 64   ;;  %s36_s28 = int_to_ptr.vmem [resolvable:$true] %s35_s28 }
   0x5   :  { %s565_s10 = smov 4   ;;  %s566_s11 = smov [#allocation2]  }
   0x6   :  { %41 = dma.hbm_to_vmem [thread:$0]  %s34_s26, 256, %s36_s28, [#allocation6], %s564_s9, %s564_s9, %s565_s10  }
   0x7   :  { %s22_s12 = sshll.u32 %s566_s11, 4  ;;  %s567_s1 = smov 128   ;;  %s23_s12 = int_to_ptr.vmem [resolvable:$true] %s22_s12 }
   0x8   :  { %s568_s13 = smov 8   ;;  %s48_s16 = sshll.u32 %s651_s3, 4  ;;  %s49_s16 = int_to_ptr.hbm [resolvable:$true] %s48_s16 }
   0x9   :  { %28 = dma.hbm_to_vmem [thread:$0]  %s21_s8, 256, %s23_s12, [#allocation3], %s567_s1, %s567_s1, %s568_s13  }
   0xa   :  { %s569_s17 = smov [#allocation7]   ;;  %s63_s20 = sshll.u32 %s653_s5, 4  ;;  %s64_s20 = int_to_ptr.hbm [resolvable:$true] %s63_s20 }
   0xb   :  { %s50_s0 = sshll.u32 %s569_s17, 4  ;;  %s570_s21 = smov [#allocation8]   ;;  %s51_s0 = int_to_ptr.vmem [resolvable:$true] %s50_s0 }
   0xc   :  { %56 = dma.hbm_to_vmem [thread:$0]  %s49_s16, 1024, %s51_s0, [#allocation6], %s564_s9, %s564_s9, %s565_s10  }
   0xd   :  { %s65_s22 = sshll.u32 %s570_s21, 4  ;;  %s66_s22 = int_to_ptr.vmem [resolvable:$true] %s65_s22 }
   0xe   :  { %71 = dma.hbm_to_vmem [thread:$0]  %s64_s20, 1024, %s66_s22, [#allocation9], %s564_s9, %s564_s9, %s565_s10  }
   0xf   :  { %555 = dma.done.wait [#allocation3], 256  }
  0x10   :  { %556 = vsyncadd [#allocation3], 4294967040 }
  0x11   :  { %557 = dma.done.wait [#allocation6], 1280  }
  0x12   :  { %558 = vsyncadd [#allocation6], 4294966016 }
  0x13   :  { %559 = dma.done.wait [#allocation9], 1024  }
  0x14   :  { %560 = vsyncadd [#allocation9], 4294966272  ;;  %v401_v0 = vld [vmem:[#allocation5 + $0x8] sm:$0xff]  ;;  %v400_v1 = vld [vmem:[#allocation5] sm:$0xff]  ;;  %vm114_vm0 = vcmask 261120   ;;  %s571_s26 = smov [#allocation10]  }
  0x15   :  { %v409_v2 = vld [vmem:[#allocation7 + $0x38] sm:$0xff]  ;;  %124 = vmatpush.bf16.msra.mxu0 %v401_v0  ;;  %v91_v3 = vld [vmem:[#allocation2] sm:$0xff]  ;;  %v92_v4 = vld [vmem:[#allocation2 + $0x8] sm:$0xff]  ;;  %s310_s27 = sshll.u32 %s571_s26, 4  ;;  %s312_s30 = sshll.u32 %s655_s7, 4  ;;  %s311_s27 = int_to_ptr.vmem [resolvable:$true] %s310_s27  ;;  %s313_s30 = int_to_ptr.hbm [resolvable:$true] %s312_s30 }
  0x16   :  { %203 = vmatpush.bf16.msra.mxu1 %v409_v2  ;;  %v408_v5 = vld [vmem:[#allocation7 + $0x30] sm:$0xff]  ;;  %v93_v6 = vpack.c.bf16 %v92_v4, %v91_v3  ;;  %v407_v7 = vld [vmem:[#allocation7 + $0x28] sm:$0xff]  ;;  %v406_v8 = vld [vmem:[#allocation7 + $0x20] sm:$0xff] }
  0x17   :  { %v405_v9 = vld [vmem:[#allocation7 + $0x18] sm:$0xff]  ;;  %v404_v10 = vld [vmem:[#allocation7 + $0x10] sm:$0xff]  ;;  %v403_v11 = vld [vmem:[#allocation7 + $0x8] sm:$0xff] }
  0x18   :  { %v402_v12 = vld [vmem:[#allocation7] sm:$0xff]  ;;  %v417_v13 = vld [vmem:[#allocation8 + $0x38] sm:$0xff]  ;;  %v416_v14 = vld [vmem:[#allocation8 + $0x30] sm:$0xff] }
  0x19   :  { %125 = vmatpush.bf16.msra.mxu0 %v400_v1  ;;  %288 = vmatpush.bf16.msra.mxu2 %v417_v13  ;;  %v415_v15 = vld [vmem:[#allocation8 + $0x28] sm:$0xff]  ;;  %v414_v16 = vld [vmem:[#allocation8 + $0x20] sm:$0xff]  ;;  %v413_v25 = vld [vmem:[#allocation8 + $0x18] sm:$0xff] }
  0x1a   :  { %204 = vmatpush.bf16.msra.mxu1 %v408_v5  ;;  %v432_v18 = vld [vmem:[%s650_s2] ss:$0 sm:$0xff]  ;;  %v412_v26 = vld [vmem:[#allocation8 + $0x10] sm:$0xff]  ;;  %v411_v27 = vld [vmem:[#allocation8 + $0x8] sm:$0xff] }
  0x1b   :  { %v410_v28 = vld [vmem:[#allocation8] sm:$0xff] }
  0x1c   :  { %335 = vmatmul.msk.bf16.vlgmr.msra.gmra.mxu0 %vm114_vm0, %v93_v6  ;;  %v433_v30 = vld [vmem:[%s652_s4] ss:$0 sm:$0xff] }
  0x1d   :  { %289 = vmatpush.bf16.msra.mxu2 %v416_v14  ;;  %v434_v38 = vld [vmem:[%s654_s6] ss:$0 sm:$0xff] }
  0x1e   :  { %205 = vmatpush.bf16.msra.mxu1 %v407_v7 }
  0x21   :  { %290 = vmatpush.bf16.msra.mxu2 %v415_v15 }
  0x22   :  { %206 = vmatpush.bf16.msra.mxu1 %v406_v8 }
  0x25   :  { %291 = vmatpush.bf16.msra.mxu2 %v414_v16 }
  0x26   :  { %207 = vmatpush.bf16.msra.mxu1 %v405_v9 }
  0x29   :  { %292 = vmatpush.bf16.msra.mxu2 %v413_v25 }
  0x2a   :  { %208 = vmatpush.bf16.msra.mxu1 %v404_v10 }
  0x2d   :  { %293 = vmatpush.bf16.msra.mxu2 %v412_v26 }
  0x2e   :  { %209 = vmatpush.bf16.msra.mxu1 %v403_v11 }
  0x31   :  { %294 = vmatpush.bf16.msra.mxu2 %v411_v27 }
  0x32   :  { %210 = vmatpush.bf16.msra.mxu1 %v402_v12 }
  0x35   :  { %295 = vmatpush.bf16.msra.mxu2 %v410_v28 }
  0x99   :  { %v127_v17 = vpop.f32.mrf.mxu0 }
  0x9a   :  { %v128_v19 = vadd.f32 %v432_v18, %v127_v17 }
  0x9c   :  { %v132_v22 = vmax.f32 %v128_v19, 0.0 }
  0xa1   :  { %v129_v20 = vpop.f32.mrf.mxu0 }
  0xa2   :  { %v130_v21 = vadd.f32 %v432_v18, %v129_v20 }
  0xa4   :  { %v133_v23 = vmax.f32 %v130_v21, 0.0 }
  0xa6   :  { %v134_v24 = vpack.c.bf16 %v133_v23, %v132_v22 }
  0xa8   :  { %211 = vmatmul.bf16.vlgmr.msra.gmra.mxu1 %v134_v24 }
 0x125   :  { %v212_v29 = vpop.f32.mrf.mxu1 }
 0x126   :  { %v213_v31 = vadd.f32 %v433_v30, %v212_v29 }
 0x128   :  { %v217_v34 = vmax.f32 %v213_v31, 0.0 }
 0x12d   :  { %v214_v32 = vpop.f32.mrf.mxu1 }
 0x12e   :  { %v215_v33 = vadd.f32 %v433_v30, %v214_v32 }
 0x130   :  { %v218_v35 = vmax.f32 %v215_v33, 0.0 }
 0x132   :  { %v219_v36 = vpack.c.bf16 %v218_v35, %v217_v34 }
 0x134   :  { %296 = vmatmul.bf16.vlgmr.msra.gmra.mxu2 %v219_v36 }
 0x1b7   :  { %v297_v37 = vpop.f32.mrf.mxu2 }
 0x1b8   :  { %v298_v40 = vadd.f32 %v434_v38, %v297_v37 }
 0x1bf   :  { %v299_v39 = vpop.f32.mrf.mxu2 }
 0x1c0   :  { %v300_v41 = vadd.f32 %v434_v38, %v299_v39 }
 0x1c2   :  { %v421_v42 = vpack.c.bf16 %v300_v41, %v298_v40 }
 0x1c4   :  { %422 = vst [vmem:[#allocation10] sm:$0xff] %v421_v42  }
 0x1c5   :  { %318 = dma.vmem_to_hbm [thread:$0]  %s311_s27, 128, %s313_s30, [#allocation4], %s564_s9, %s564_s9, %s565_s10  }
 0x1c6   :  { %561 = dma.done.wait [#allocation4], 128  }
 0x1c7   :  { %562 = vsyncadd [#allocation4], 4294967168 }
 0x1c8   :  { %323 = vsyncpa [#allocation3], 1 }
 0x1c9   :  { %324 = vsyncpa [#allocation6], 1 }
 0x1ca   :  { %325 = vsyncpa [#allocation9], 1 }
 0x1cb   :  { %326 = vsyncpa [#allocation4], 1 }

</bundles_post_ra>
